<compile_context>
chip_gen: v7x
topology: tpu7x:2x2x1
jax: 0.10.0
libtpu: 0.0.40
codegen_flags: <defaults>
</compile_context>

<pallas_src>
import functools
import math

import jax
import jax.numpy as jnp
from jax.experimental import pallas as pl

LANE = 128     # lane width: last-dim padding
SUBLANE = 8    # sublane width: second-to-last-dim padding


def _round_up(n, m):
    return ((n + m - 1) // m) * m


def _sigmoid(z):
    # exp and the approximate reciprocal both issue on the (otherwise idle)
    # EUP slot, so the epilogue does not compete with the VPU.
    return pl.reciprocal(1.0 + jnp.exp(-z), approx=True)


# --------------------------------------------------------------------------
# Fused kernel: n_chain sigmoid-encoders, then the "tap" AE
# (encoder [+ decoder] + y head), all in one invocation, all data in VMEM.
#
# Ref layout (inputs then outputs; weights already transposed & zero-padded):
#   x, [We_i, be_i] * n_chain, We_tap, be_tap, Wy, by, [Wd, bd if decode],
#   outputs:
#     decode=False : H_out, y_out
#     decode=True  : inputs_out, recon_out, y_out
# --------------------------------------------------------------------------
@functools.lru_cache(maxsize=None)
def _make_sae_kernel(n_chain, decode):
    def kernel(*refs):
        h = refs[0][...]
        idx = 1
        for _ in range(n_chain):
            w, b = refs[idx][...], refs[idx + 1][...]
            idx += 2
            h = _sigmoid(jnp.dot(h, w, preferred_element_type=jnp.float32) + b)

        we, be = refs[idx][...], refs[idx + 1][...]
        idx += 2
        wy, by = refs[idx][...], refs[idx + 1][...]
        idx += 2

        H = _sigmoid(jnp.dot(h, we, preferred_element_type=jnp.float32) + be)
        y = _sigmoid(jnp.dot(H, wy, preferred_element_type=jnp.float32) + by)

        if decode:
            wd, bd = refs[idx], refs[idx + 1]
            idx += 2
            recon = _sigmoid(
                jnp.dot(H, wd[...], preferred_element_type=jnp.float32) + bd[...]
            )
            inputs_ref, recon_ref, y_ref = refs[idx], refs[idx + 1], refs[idx + 2]
            inputs_ref[...] = h          # activation fed into the tap AE
            recon_ref[...] = recon
            y_ref[...] = y
        else:
            h_ref, y_ref = refs[idx], refs[idx + 1]
            h_ref[...] = H
            y_ref[...] = y

    return kernel


# ------------------------- parameters (pre-transposed, pre-padded) ---------


def _prep_linear(w, b):
    """w: (out, in) PyTorch layout -> (W^T zero-padded to (kpad, npad), b (1, npad))."""
    out_dim, in_dim = w.shape
    kpad = _round_up(in_dim, LANE)
    npad = _round_up(out_dim, LANE)
    wt = jnp.zeros((kpad, npad), jnp.float32).at[:in_dim, :out_dim].set(w.T)
    bp = jnp.zeros((1, npad), jnp.float32).at[:, :out_dim].set(b)
    return wt, bp


def _init_linear(key, out_dim, in_dim):
    k_w, k_b = jax.random.split(key)
    bound = 1.0 / math.sqrt(in_dim)
    w = jax.random.uniform(k_w, (out_dim, in_dim), jnp.float32, -bound, bound)
    b = jax.random.uniform(k_b, (out_dim,), jnp.float32, -bound, bound)
    return _prep_linear(w, b)


def _init_ae(key, input_dim, latent_dim):
    k_e, k_d, k_y = jax.random.split(key, 3)
    return {
        "enc": _init_linear(k_e, latent_dim, input_dim),   # Linear(input, latent)
        "dec": _init_linear(k_d, input_dim, latent_dim),   # Linear(latent, input)
        "y": _init_linear(k_y, 1, latent_dim),             # Linear(latent, 1)
        "input_dim": input_dim,
        "latent_dim": latent_dim,
    }


def init_sae(key, ae_dims):
    num_ae = len(ae_dims)
    keys = jax.random.split(key, num_ae)
    params = []
    for i in range(1, num_ae + 1):
        if i != num_ae:
            params.append(_init_ae(keys[i - 1], ae_dims[i - 1], ae_dims[i]))
        else:
            params.append(_init_ae(keys[i - 1], ae_dims[-1], ae_dims[-1]))
    return params


# ------------------------- fused forward (mirrors SAE.forward) --------------


def sae_forward(params, x, layer_idx=0, preTrain=False):
    batch, in_dim = x.shape
    bpad = _round_up(batch, SUBLANE)
    xpad = _round_up(in_dim, LANE)
    xp = jnp.zeros((bpad, xpad), jnp.float32).at[:batch, :in_dim].set(x)

    if preTrain:
        n_chain = layer_idx
        chain = params[:layer_idx]
        tap = params[layer_idx]
    else:
        n_chain = len(params) - 1
        chain = params[:-1]
        tap = params[-1]

    flat = [xp]
    for p in chain:
        flat += [p["enc"][0], p["enc"][1]]
    flat += [tap["enc"][0], tap["enc"][1], tap["y"][0], tap["y"][1]]

    if preTrain:
        flat += [tap["dec"][0], tap["dec"][1]]
        in_dim_tap = tap["input_dim"]
        ip = _round_up(in_dim_tap, LANE)
        out_shapes = (
            jax.ShapeDtypeStruct((bpad, ip), jnp.float32),    # inputs (pre-tap act.)
            jax.ShapeDtypeStruct((bpad, ip), jnp.float32),    # reconstruction
            jax.ShapeDtypeStruct((bpad, LANE), jnp.float32),  # y estimate (padded)
        )
        # Grid-less call: every array is a single whole-array VMEM block.
        inputs_p, recon_p, y_p = pl.pallas_call(
            _make_sae_kernel(n_chain, True),
            out_shape=out_shapes,
        )(*flat)
        return (
            inputs_p[:batch, :in_dim_tap],
            recon_p[:batch, :in_dim_tap],
            y_p[:batch, :1],
        )
    else:
        lat = tap["latent_dim"]
        lp = _round_up(lat, LANE)
        out_shapes = (
            jax.ShapeDtypeStruct((bpad, lp), jnp.float32),    # H
            jax.ShapeDtypeStruct((bpad, LANE), jnp.float32),  # y estimate (padded)
        )
        H_p, y_p = pl.pallas_call(
            _make_sae_kernel(n_chain, False),
            out_shape=out_shapes,
        )(*flat)
        return H_p[:batch, :lat], y_p[:batch, :1]


# ------------------------- pure-JAX reference for validation ----------------


def _unpad_linear(p, in_dim, out_dim):
    wt, b = p
    return wt[:in_dim, :out_dim], b[0, :out_dim]


def sae_forward_ref(params, x, layer_idx=0, preTrain=False):
    def lin_sig(h, p, in_dim, out_dim):
        wt, b = _unpad_linear(p, in_dim, out_dim)
        return jax.nn.sigmoid(h @ wt + b)

    h = x
    if preTrain:
        for i in range(layer_idx):
            p = params[i]
            h = lin_sig(h, p["enc"], p["input_dim"], p["latent_dim"])
        tap = params[layer_idx]
        inputs = h
        H = lin_sig(h, tap["enc"], tap["input_dim"], tap["latent_dim"])
        recon = lin_sig(H, tap["dec"], tap["latent_dim"], tap["input_dim"])
        y = lin_sig(H, tap["y"], tap["latent_dim"], 1)
        return inputs, recon, y
    else:
        for i in range(len(params) - 1):
            p = params[i]
            h = lin_sig(h, p["enc"], p["input_dim"], p["latent_dim"])
        tap = params[-1]
        H = lin_sig(h, tap["enc"], tap["input_dim"], tap["latent_dim"])
        y = lin_sig(H, tap["y"], tap["latent_dim"], 1)
        return H, y


# TODO(synk): param.requires_grad toggling in SAE.forward is training-only
# autograd bookkeeping with no forward-pass effect; not translated.


if __name__ == "__main__":
    key = jax.random.PRNGKey(0)
    k_x, k_p = jax.random.split(key)

    # SAE built from AE_list = [64, 32, 16]:
    #   AE0: 64 -> 32,  AE1: 32 -> 16,  AE2: 16 -> 16 (last AE uses AE_list[-1] twice)
    ae_dims = [64, 32, 16]
    params = init_sae(k_p, ae_dims)

    batch = 8
    x = jax.random.normal(k_x, (batch, ae_dims[0]), jnp.float32)

    # Main path (preTrain=False): chain of sigmoid encoders, then (H, y_estimate).
    H, y_est = sae_forward(params, x, layer_idx=0, preTrain=False)
    jax.block_until_ready((H, y_est))
    assert H.shape == (batch, ae_dims[-1]) and y_est.shape == (batch, 1)

    # preTrain path, layer_idx=1: (inputs, reconstruction, y_estimate).
    inp, rec, y2 = sae_forward(params, x, layer_idx=1, preTrain=True)
    jax.block_until_ready((inp, rec, y2))
    assert inp.shape == (batch, 32) and rec.shape == (batch, 32) and y2.shape == (batch, 1)

    # preTrain path, layer_idx=0 (exercises the n_chain == 0 case).
    inp0, rec0, y0 = sae_forward(params, x, layer_idx=0, preTrain=True)
    jax.block_until_ready((inp0, rec0, y0))
    assert inp0.shape == (batch, 64) and rec0.shape == (batch, 64) and y0.shape == (batch, 1)

    # Numeric sanity check vs. a pure-JAX reference (loose tolerance because the
    # kernel uses the hardware approximate reciprocal for the sigmoid).
    H_r, y_r = sae_forward_ref(params, x, layer_idx=0, preTrain=False)
    inp_r, rec_r, y2_r = sae_forward_ref(params, x, layer_idx=1, preTrain=True)
    for got, ref in [(H, H_r), (y_est, y_r), (inp, inp_r), (rec, rec_r), (y2, y2_r)]:
        assert jnp.allclose(got, ref, atol=2e-2, rtol=2e-2), float(
            jnp.max(jnp.abs(got - ref))
        )

    print("KERNEL_OK")
</pallas_src>

<mosaic_0001>
module attributes {stable_mosaic.version = 11 : i64} {
  func.func @kernel(%arg0: memref<8x128xf32, #tpu.memory_space<vmem>>, %arg1: memref<128x128xf32, #tpu.memory_space<vmem>>, %arg2: memref<1x128xf32, #tpu.memory_space<vmem>>, %arg3: memref<128x128xf32, #tpu.memory_space<vmem>>, %arg4: memref<1x128xf32, #tpu.memory_space<vmem>>, %arg5: memref<128x128xf32, #tpu.memory_space<vmem>>, %arg6: memref<1x128xf32, #tpu.memory_space<vmem>>, %arg7: memref<128x128xf32, #tpu.memory_space<vmem>>, %arg8: memref<1x128xf32, #tpu.memory_space<vmem>>, %arg9: memref<8x128xf32, #tpu.memory_space<vmem>>, %arg10: memref<8x128xf32, #tpu.memory_space<vmem>>) attributes {dimension_semantics = [], scalar_prefetch = 0 : i64, scratch_operands = 0 : i64, tpu.core_type = #tpu.core_type<tc>} {
    %c0 = arith.constant 0 : index
    %c0_0 = arith.constant 0 : index
    %0 = vector.load %arg0[%c0, %c0_0] : memref<8x128xf32, #tpu.memory_space<vmem>>, vector<8x128xf32>
    %c0_1 = arith.constant 0 : index
    %c0_2 = arith.constant 0 : index
    %1 = vector.load %arg1[%c0_1, %c0_2] : memref<128x128xf32, #tpu.memory_space<vmem>>, vector<128x128xf32>
    %c0_3 = arith.constant 0 : index
    %c0_4 = arith.constant 0 : index
    %2 = vector.load %arg2[%c0_3, %c0_4] : memref<1x128xf32, #tpu.memory_space<vmem>>, vector<1x128xf32>
    %cst = arith.constant dense<0.000000e+00> : vector<8x128xf32>
    %3 = tpu.matmul %0, %1, %cst {dimension_numbers = #tpu.dot_dimension_numbers<[1], [0], [0], [1], [0, 0, 1, 1], [], []>} : vector<8x128xf32>, vector<128x128xf32>, vector<8x128xf32> -> vector<8x128xf32>
    %4 = vector.broadcast %2 : vector<1x128xf32> to vector<8x128xf32>
    %5 = arith.addf %3, %4 : vector<8x128xf32>
    %cst_5 = arith.constant 0.000000e+00 : f32
    %6 = vector.broadcast %cst_5 : f32 to vector<8x128xf32>
    %7 = arith.subf %6, %5 : vector<8x128xf32>
    %8 = math.exp %7 : vector<8x128xf32>
    %cst_6 = arith.constant 1.000000e+00 : f32
    %9 = vector.broadcast %cst_6 : f32 to vector<8x128xf32>
    %10 = arith.addf %9, %8 : vector<8x128xf32>
    %11 = tpu.reciprocal %10 {approx = true} : vector<8x128xf32> -> vector<8x128xf32>
    %c0_7 = arith.constant 0 : index
    %c0_8 = arith.constant 0 : index
    %12 = vector.load %arg3[%c0_7, %c0_8] : memref<128x128xf32, #tpu.memory_space<vmem>>, vector<128x128xf32>
    %c0_9 = arith.constant 0 : index
    %c0_10 = arith.constant 0 : index
    %13 = vector.load %arg4[%c0_9, %c0_10] : memref<1x128xf32, #tpu.memory_space<vmem>>, vector<1x128xf32>
    %cst_11 = arith.constant dense<0.000000e+00> : vector<8x128xf32>
    %14 = tpu.matmul %11, %12, %cst_11 {dimension_numbers = #tpu.dot_dimension_numbers<[1], [0], [0], [1], [0, 0, 1, 1], [], []>} : vector<8x128xf32>, vector<128x128xf32>, vector<8x128xf32> -> vector<8x128xf32>
    %15 = vector.broadcast %13 : vector<1x128xf32> to vector<8x128xf32>
    %16 = arith.addf %14, %15 : vector<8x128xf32>
    %cst_12 = arith.constant 0.000000e+00 : f32
    %17 = vector.broadcast %cst_12 : f32 to vector<8x128xf32>
    %18 = arith.subf %17, %16 : vector<8x128xf32>
    %19 = math.exp %18 : vector<8x128xf32>
    %cst_13 = arith.constant 1.000000e+00 : f32
    %20 = vector.broadcast %cst_13 : f32 to vector<8x128xf32>
    %21 = arith.addf %20, %19 : vector<8x128xf32>
    %22 = tpu.reciprocal %21 {approx = true} : vector<8x128xf32> -> vector<8x128xf32>
    %c0_14 = arith.constant 0 : index
    %c0_15 = arith.constant 0 : index
    %23 = vector.load %arg5[%c0_14, %c0_15] : memref<128x128xf32, #tpu.memory_space<vmem>>, vector<128x128xf32>
    %c0_16 = arith.constant 0 : index
    %c0_17 = arith.constant 0 : index
    %24 = vector.load %arg6[%c0_16, %c0_17] : memref<1x128xf32, #tpu.memory_space<vmem>>, vector<1x128xf32>
    %c0_18 = arith.constant 0 : index
    %c0_19 = arith.constant 0 : index
    %25 = vector.load %arg7[%c0_18, %c0_19] : memref<128x128xf32, #tpu.memory_space<vmem>>, vector<128x128xf32>
    %c0_20 = arith.constant 0 : index
    %c0_21 = arith.constant 0 : index
    %26 = vector.load %arg8[%c0_20, %c0_21] : memref<1x128xf32, #tpu.memory_space<vmem>>, vector<1x128xf32>
    %cst_22 = arith.constant dense<0.000000e+00> : vector<8x128xf32>
    %27 = tpu.matmul %22, %23, %cst_22 {dimension_numbers = #tpu.dot_dimension_numbers<[1], [0], [0], [1], [0, 0, 1, 1], [], []>} : vector<8x128xf32>, vector<128x128xf32>, vector<8x128xf32> -> vector<8x128xf32>
    %28 = vector.broadcast %24 : vector<1x128xf32> to vector<8x128xf32>
    %29 = arith.addf %27, %28 : vector<8x128xf32>
    %cst_23 = arith.constant 0.000000e+00 : f32
    %30 = vector.broadcast %cst_23 : f32 to vector<8x128xf32>
    %31 = arith.subf %30, %29 : vector<8x128xf32>
    %32 = math.exp %31 : vector<8x128xf32>
    %cst_24 = arith.constant 1.000000e+00 : f32
    %33 = vector.broadcast %cst_24 : f32 to vector<8x128xf32>
    %34 = arith.addf %33, %32 : vector<8x128xf32>
    %35 = tpu.reciprocal %34 {approx = true} : vector<8x128xf32> -> vector<8x128xf32>
    %cst_25 = arith.constant dense<0.000000e+00> : vector<8x128xf32>
    %36 = tpu.matmul %35, %25, %cst_25 {dimension_numbers = #tpu.dot_dimension_numbers<[1], [0], [0], [1], [0, 0, 1, 1], [], []>} : vector<8x128xf32>, vector<128x128xf32>, vector<8x128xf32> -> vector<8x128xf32>
    %37 = vector.broadcast %26 : vector<1x128xf32> to vector<8x128xf32>
    %38 = arith.addf %36, %37 : vector<8x128xf32>
    %cst_26 = arith.constant 0.000000e+00 : f32
    %39 = vector.broadcast %cst_26 : f32 to vector<8x128xf32>
    %40 = arith.subf %39, %38 : vector<8x128xf32>
    %41 = math.exp %40 : vector<8x128xf32>
    %cst_27 = arith.constant 1.000000e+00 : f32
    %42 = vector.broadcast %cst_27 : f32 to vector<8x128xf32>
    %43 = arith.addf %42, %41 : vector<8x128xf32>
    %44 = tpu.reciprocal %43 {approx = true} : vector<8x128xf32> -> vector<8x128xf32>
    %c0_28 = arith.constant 0 : index
    %c0_29 = arith.constant 0 : index
    %45 = vector.load %arg9[%c0_28, %c0_29] : memref<8x128xf32, #tpu.memory_space<vmem>>, vector<8x128xf32>
    tpu.vector_store %arg9[%c0_28, %c0_29], %35 {strides = array<i32>} : memref<8x128xf32, #tpu.memory_space<vmem>>, vector<8x128xf32>,
    %c0_30 = arith.constant 0 : index
    %c0_31 = arith.constant 0 : index
    %46 = vector.load %arg10[%c0_30, %c0_31] : memref<8x128xf32, #tpu.memory_space<vmem>>, vector<8x128xf32>
    tpu.vector_store %arg10[%c0_30, %c0_31], %44 {strides = array<i32>} : memref<8x128xf32, #tpu.memory_space<vmem>>, vector<8x128xf32>,
    return
  }
}

</mosaic_0001>

<bundles_post_ra>
// kernel: tpu_custom_call.1
= control target key start
LH: loop header
LB: loop body
LE: loop exit
PB: predicated region body
PF: predicated region fallthrough
CT: control target
= control target key end

     0   :  { %16 = vsyncpa [#allocation3], 0  ;;  %s1243_s0 = inlined_call_operand.hbm [shape: f32[8,128], index: 0, kind: input, shape index: {}]   ;;  %s1244_s1 = inlined_call_operand.hbm [shape: f32[128,128], index: 1, kind: input, shape index: {}]   ;;  %s1245_s2 = inlined_call_operand.vmem [shape: f32[1,128], index: 2, kind: input, shape index: {}]   ;;  %s1246_s3 = inlined_call_operand.hbm [shape: f32[128,128], index: 3, kind: input, shape index: {}]   ;;  %s1247_s4 = inlined_call_operand.vmem [shape: f32[1,128], index: 4, kind: input, shape index: {}]   ;;  %s1248_s5 = inlined_call_operand.hbm [shape: f32[128,128], index: 5, kind: input, shape index: {}]   ;;  %s1249_s6 = inlined_call_operand.vmem [shape: f32[1,128], index: 6, kind: input, shape index: {}]   ;;  %s1250_s7 = inlined_call_operand.hbm [shape: f32[128,128], index: 7, kind: input, shape index: {}]   ;;  %s1251_s8 = inlined_call_operand.vmem [shape: f32[1,128], index: 8, kind: input, shape index: {}]   ;;  %s1252_s9 = inlined_call_operand.hbm [shape: f32[8,128], index: 9, kind: output, shape index: {0}]   ;;  %s1253_s10 = inlined_call_operand.hbm [shape: f32[8,128], index: 10, kind: output, shape index: {1}]  }
   0x1   :  { %17 = vsyncpa [#allocation6], 0 }
   0x2   :  { %18 = vsyncpa [#allocation9], 0 }
   0x3   :  { %19 = vsyncpa [#allocation4], 0 }
   0x4   :  { %20 = vsyncpa [#allocation13], 0  ;;  %s1028_s13 = smov [#allocation5]   ;;  %s864_s17 = scalar_lea.hbm %s1244_s1, 2048 }
   0x5   :  { %s36_s14 = sshll.u32 %s1028_s13, 4  ;;  %p865_p0 = scmp.ne.s32.totalorder %s1244_s1, %s864_s17  ;;  %s37_s14 = int_to_ptr.vmem [resolvable:$true] %s36_s14 }
   0x6   :  { %p868_p1 = scmp.lt.u32.totalorder %s864_s17, %s1244_s1 }
   0x8   :  { %p870_p2 = pnand %p868_p1, %p865_p0 }
   0xa   :  { %873 = shalt.err (!%p870_p2)
}
   0xb   :  { %s874_s22 = scalar_lea.vmem %s37_s14, 2048  ;;  %p879_p4 = scmp.lt.s32.totalorder %s37_s14, %s37_s14 }
   0xc   :  { %p875_p3 = scmp.ne.s32.totalorder %s37_s14, %s874_s22  ;;  %p880_p5 = scmp.lt.s32.totalorder %s874_s22, %s874_s22 }
   0xe   :  { %p881_p6 = por %p880_p5, %p879_p4 }
  0x10   :  { %p882_p7 = pnand %p881_p6, %p875_p3 }
  0x12   :  { %885 = shalt.err (!%p882_p7)
}
  0x13   :  { %s1029_s23 = smov 128   ;;  %s1030_s24 = smov 8  }
  0x14   :  { %42 = dma.hbm_to_vmem [thread:$0]  %s1244_s1, 2048, %s37_s14, [#allocation6], %s1029_s23, %s1029_s23, %s1030_s24  }
  0x15   :  { %s1031_s27 = smov [#allocation8]   ;;  %s1032_s29 = smov [#allocation2]  }
  0x16   :  { %s64_s28 = sshll.u32 %s1031_s27, 4  ;;  %s27_s30 = sshll.u32 %s1032_s29, 4  ;;  %s65_s28 = int_to_ptr.vmem [resolvable:$true] %s64_s28  ;;  %s28_s30 = int_to_ptr.vmem [resolvable:$true] %s27_s30 }
  0x17   :  { %s886_s13 = scalar_lea.hbm %s1248_s5, 2048 }
  0x18   :  { %p887_p8 = scmp.ne.s32.totalorder %s1248_s5, %s886_s13  ;;  %p890_p9 = scmp.lt.u32.totalorder %s886_s13, %s1248_s5 }
  0x1a   :  { %p892_p10 = pnand %p890_p9, %p887_p8 }
  0x1c   :  { %895 = shalt.err (!%p892_p10)
}
  0x1d   :  { %s896_s1 = scalar_lea.vmem %s65_s28, 2048  ;;  %p901_p12 = scmp.lt.s32.totalorder %s65_s28, %s65_s28 }
  0x1e   :  { %p897_p11 = scmp.ne.s32.totalorder %s65_s28, %s896_s1  ;;  %p902_p13 = scmp.lt.s32.totalorder %s896_s1, %s896_s1 }
  0x20   :  { %p903_p0 = por %p902_p13, %p901_p12 }
  0x22   :  { %p904_p1 = pnand %p903_p0, %p897_p11 }
  0x24   :  { %907 = shalt.err (!%p904_p1)
}
  0x25   :  { %70 = dma.hbm_to_vmem [thread:$0]  %s1248_s5, 2048, %s65_s28, [#allocation9], %s1029_s23, %s1029_s23, %s1030_s24  }
  0x26   :  { %s908_s22 = scalar_lea.hbm %s1243_s0, 128 }
  0x27   :  { %p909_p2 = scmp.ne.s32.totalorder %s1243_s0, %s908_s22  ;;  %p912_p3 = scmp.lt.u32.totalorder %s908_s22, %s1243_s0 }
  0x29   :  { %p914_p4 = pnand %p912_p3, %p909_p2 }
  0x2b   :  { %917 = shalt.err (!%p914_p4)
}
  0x2c   :  { %s918_s11 = scalar_lea.vmem %s28_s30, 128  ;;  %p923_p6 = scmp.lt.s32.totalorder %s28_s30, %s28_s30 }
  0x2d   :  { %p919_p5 = scmp.ne.s32.totalorder %s28_s30, %s918_s11  ;;  %p924_p7 = scmp.lt.s32.totalorder %s918_s11, %s918_s11 }
  0x2f   :  { %p925_p8 = por %p924_p7, %p923_p6 }
  0x31   :  { %p926_p9 = pnand %p925_p8, %p919_p5 }
  0x33   :  { %929 = shalt.err (!%p926_p9)
}
  0x34   :  { %30 = dma.hbm_to_vmem [thread:$0]  %s1243_s0, 128, %s28_s30, [#allocation3]  }
  0x35   :  { %s1033_s12 = smov [#allocation7]   ;;  %s1034_s15 = smov [#allocation10]  }
  0x36   :  { %s50_s13 = sshll.u32 %s1033_s12, 4  ;;  %s78_s16 = sshll.u32 %s1034_s15, 4  ;;  %s51_s13 = int_to_ptr.vmem [resolvable:$true] %s50_s13  ;;  %s79_s16 = int_to_ptr.vmem [resolvable:$true] %s78_s16 }
  0x37   :  { %s930_s1 = scalar_lea.hbm %s1246_s3, 2048 }
  0x38   :  { %p931_p10 = scmp.ne.s32.totalorder %s1246_s3, %s930_s1  ;;  %p934_p11 = scmp.lt.u32.totalorder %s930_s1, %s1246_s3 }
  0x3a   :  { %p936_p12 = pnand %p934_p11, %p931_p10 }
  0x3c   :  { %939 = shalt.err (!%p936_p12)
}
  0x3d   :  { %s940_s0 = scalar_lea.vmem %s51_s13, 2048  ;;  %p945_p0 = scmp.lt.s32.totalorder %s51_s13, %s51_s13 }
  0x3e   :  { %p941_p13 = scmp.ne.s32.totalorder %s51_s13, %s940_s0  ;;  %p946_p1 = scmp.lt.s32.totalorder %s940_s0, %s940_s0 }
  0x40   :  { %p947_p2 = por %p946_p1, %p945_p0 }
  0x42   :  { %p948_p3 = pnand %p947_p2, %p941_p13 }
  0x44   :  { %951 = shalt.err (!%p948_p3)
}
  0x45   :  { %56 = dma.hbm_to_vmem [thread:$0]  %s1246_s3, 2048, %s51_s13, [#allocation6], %s1029_s23, %s1029_s23, %s1030_s24  }
  0x46   :  { %s952_s27 = scalar_lea.hbm %s1250_s7, 2048 }
  0x47   :  { %p953_p4 = scmp.ne.s32.totalorder %s1250_s7, %s952_s27  ;;  %p956_p5 = scmp.lt.u32.totalorder %s952_s27, %s1250_s7 }
  0x49   :  { %p958_p6 = pnand %p956_p5, %p953_p4 }
  0x4b   :  { %961 = shalt.err (!%p958_p6)
}
  0x4c   :  { %s962_s12 = scalar_lea.vmem %s79_s16, 2048  ;;  %p967_p8 = scmp.lt.s32.totalorder %s79_s16, %s79_s16 }
  0x4d   :  { %p963_p7 = scmp.ne.s32.totalorder %s79_s16, %s962_s12  ;;  %p968_p9 = scmp.lt.s32.totalorder %s962_s12, %s962_s12 }
  0x4f   :  { %p969_p10 = por %p968_p9, %p967_p8 }
  0x51   :  { %p970_p11 = pnand %p969_p10, %p963_p7 }
  0x53   :  { %973 = shalt.err (!%p970_p11)
}
  0x54   :  { %84 = dma.hbm_to_vmem [thread:$0]  %s1250_s7, 2048, %s79_s16, [#allocation9], %s1029_s23, %s1029_s23, %s1030_s24  }
  0x55   :  { %1018 = dma.done.wait [#allocation3], 128  }
  0x56   :  { %1019 = vsyncadd [#allocation3], 4294967168 }
  0x57   :  { %1020 = dma.done.wait [#allocation6], 4096  }
  0x58   :  { %1021 = vsyncadd [#allocation6], 4294963200 }
  0x59   :  { %1022 = dma.done.wait [#allocation9], 4096  }
  0x5a   :  { %1023 = vsyncadd [#allocation9], 4294963200  ;;  %v1035_v0 = vmov 0.0|0.0   ;;  %vm1036_vm0 = vmmov 0   ;;  %v1037_v1 = vmov 0.0   ;;  %v103_v2 = vld [vmem:[#allocation5] sm:$0xff] }
  0x5b   :  { %740 = vmatprep.subr.bf16.mxu0 %v1035_v0  ;;  %632 = vmatprep.mubr.msk.f32.mxu0 %vm1036_vm0, %v1037_v1  ;;  %v104_v3 = vld [vmem:[#allocation5 + $0x8] sm:$0xff]  ;;  %v105_v4 = vld [vmem:[#allocation5 + $0x10] sm:$0xff]  ;;  %v106_v6 = vld [vmem:[#allocation5 + $0x18] sm:$0xff]  ;;  %s1038_s16 = smov [#allocation11]  }
  0x5c   :  { %764 = vmatprep.subr.bf16.mxu1 %v1035_v0  ;;  %667 = vmatprep.mubr.msk.f32.mxu1 %vm1036_vm0, %v1037_v1  ;;  %v741_v5 = vpack.c.bf16 %v104_v3, %v103_v2  ;;  %v744_v7 = vpack.c.bf16 %v106_v6, %v105_v4  ;;  %v107_v8 = vld [vmem:[#allocation5 + $0x20] sm:$0xff]  ;;  %v108_v9 = vld [vmem:[#allocation5 + $0x28] sm:$0xff]  ;;  %v109_v11 = vld [vmem:[#allocation5 + $0x30] sm:$0xff]  ;;  %s503_s17 = sshll.u32 %s1038_s16, 4  ;;  %s504_s17 = int_to_ptr.vmem [resolvable:$true] %s503_s17 }
  0x5d   :  { %v747_v10 = vpack.c.bf16 %v108_v9, %v107_v8  ;;  %v110_v12 = vld [vmem:[#allocation5 + $0x38] sm:$0xff]  ;;  %v111_v14 = vld [vmem:[#allocation5 + $0x40] sm:$0xff]  ;;  %v112_v15 = vld [vmem:[#allocation5 + $0x48] sm:$0xff]  ;;  %s974_s18 = scalar_lea.vmem %s504_s17, 128  ;;  %p979_p13 = scmp.lt.s32.totalorder %s504_s17, %s504_s17 }
  0x5e   :  { %742 = vmatpush3.bf16.msra.mxu0 %v741_v5  ;;  %v750_v13 = vpack.c.bf16 %v110_v12, %v109_v11  ;;  %v753_v16 = vpack.c.bf16 %v112_v15, %v111_v14  ;;  %v113_v17 = vld [vmem:[#allocation5 + $0x50] sm:$0xff]  ;;  %v114_v18 = vld [vmem:[#allocation5 + $0x58] sm:$0xff]  ;;  %v115_v20 = vld [vmem:[#allocation5 + $0x60] sm:$0xff]  ;;  %p975_p12 = scmp.ne.s32.totalorder %s504_s17, %s974_s18  ;;  %p980_p0 = scmp.lt.s32.totalorder %s974_s18, %s974_s18 }
  0x5f   :  { %743 = vmatprep.subr.bf16.mxu0 %v1035_v0  ;;  %v756_v19 = vpack.c.bf16 %v114_v18, %v113_v17  ;;  %v116_v21 = vld [vmem:[#allocation5 + $0x68] sm:$0xff]  ;;  %v117_v23 = vld [vmem:[#allocation5 + $0x70] sm:$0xff]  ;;  %v118_v24 = vld [vmem:[#allocation5 + $0x78] sm:$0xff] }
  0x60   :  { %v759_v22 = vpack.c.bf16 %v116_v21, %v115_v20  ;;  %v762_v25 = vpack.c.bf16 %v118_v24, %v117_v23  ;;  %v102_v26 = vld [vmem:[#allocation2] sm:$0xff]  ;;  %v201_v27 = vld [vmem:[#allocation7] sm:$0xff]  ;;  %v202_v28 = vld [vmem:[#allocation7 + $0x8] sm:$0xff]  ;;  %p981_p1 = por %p980_p0, %p979_p13 }
  0x61   :  { %v765_v29 = vpack.c.bf16 %v202_v28, %v201_v27  ;;  %v203_v30 = vld [vmem:[#allocation7 + $0x10] sm:$0xff]  ;;  %v204_v31 = vld [vmem:[#allocation7 + $0x18] sm:$0xff]  ;;  %v205_v33 = vld [vmem:[#allocation7 + $0x20] sm:$0xff] }
  0x62   :  { %745 = vmatpush3.bf16.msra.mxu0 %v744_v7  ;;  %v768_v32 = vpack.c.bf16 %v204_v31, %v203_v30  ;;  %v206_v34 = vld [vmem:[#allocation7 + $0x28] sm:$0xff]  ;;  %v207_v36 = vld [vmem:[#allocation7 + $0x30] sm:$0xff]  ;;  %v208_v37 = vld [vmem:[#allocation7 + $0x38] sm:$0xff]  ;;  %p982_p2 = pnand %p981_p1, %p975_p12 }
  0x63   :  { %746 = vmatprep.subr.bf16.mxu0 %v1035_v0  ;;  %766 = vmatpush3.bf16.msra.mxu1 %v765_v29  ;;  %v771_v35 = vpack.c.bf16 %v206_v34, %v205_v33  ;;  %v774_v38 = vpack.c.bf16 %v208_v37, %v207_v36  ;;  %v209_v39 = vld [vmem:[#allocation7 + $0x40] sm:$0xff]  ;;  %v210_v40 = vld [vmem:[#allocation7 + $0x48] sm:$0xff]  ;;  %v211_v42 = vld [vmem:[#allocation7 + $0x50] sm:$0xff] }
  0x64   :  { %767 = vmatprep.subr.bf16.mxu1 %v1035_v0  ;;  %v777_v41 = vpack.c.bf16 %v210_v40, %v209_v39  ;;  %v212_v43 = vld [vmem:[#allocation7 + $0x58] sm:$0xff]  ;;  %v213_v45 = vld [vmem:[#allocation7 + $0x60] sm:$0xff]  ;;  %v214_v46 = vld [vmem:[#allocation7 + $0x68] sm:$0xff] }
  0x65   :  { %v780_v44 = vpack.c.bf16 %v212_v43, %v211_v42  ;;  %v783_v47 = vpack.c.bf16 %v214_v46, %v213_v45  ;;  %v215_v48 = vld [vmem:[#allocation7 + $0x70] sm:$0xff]  ;;  %v216_v49 = vld [vmem:[#allocation7 + $0x78] sm:$0xff]  ;;  %v299_v60 = vld [vmem:[#allocation8] sm:$0xff] }
  0x66   :  { %748 = vmatpush3.bf16.msra.mxu0 %v747_v10  ;;  %v786_v50 = vpack.c.bf16 %v216_v49, %v215_v48  ;;  %v528_v51 = vld [vmem:[%s1245_s2] ss:$0 sm:$0xff]  ;;  %v300_v61 = vld [vmem:[#allocation8 + $0x8] sm:$0xff]  ;;  %v301_v63 = vld [vmem:[#allocation8 + $0x10] sm:$0xff] }
  0x67   :  { %749 = vmatprep.subr.bf16.mxu0 %v1035_v0  ;;  %769 = vmatpush3.bf16.msra.mxu1 %v768_v32  ;;  %v789_v62 = vpack.c.bf16 %v300_v61, %v299_v60  ;;  %v302_v2 = vld [vmem:[#allocation8 + $0x18] sm:$0xff]  ;;  %v303_v4 = vld [vmem:[#allocation8 + $0x20] sm:$0xff]  ;;  %v304_v5 = vld [vmem:[#allocation8 + $0x28] sm:$0xff] }
  0x68   :  { %770 = vmatprep.subr.bf16.mxu1 %v1035_v0  ;;  %v792_v3 = vpack.c.bf16 %v302_v2, %v301_v63  ;;  %v795_v6 = vpack.c.bf16 %v304_v5, %v303_v4  ;;  %v305_v7 = vld [vmem:[#allocation8 + $0x30] sm:$0xff]  ;;  %v307_v9 = vld [vmem:[#allocation8 + $0x40] sm:$0xff]  ;;  %v308_v10 = vld [vmem:[#allocation8 + $0x48] sm:$0xff] }
  0x69   :  { %v801_v11 = vpack.c.bf16 %v308_v10, %v307_v9  ;;  %v309_v12 = vld [vmem:[#allocation8 + $0x50] sm:$0xff]  ;;  %v311_v15 = vld [vmem:[#allocation8 + $0x60] sm:$0xff]  ;;  %v529_v21 = vld [vmem:[%s1247_s4] ss:$0 sm:$0xff] }
  0x6a   :  { %751 = vmatpush3.bf16.msra.mxu0 %v750_v13  ;;  %v310_v13 = vld [vmem:[#allocation8 + $0x58] sm:$0xff]  ;;  %v313_v18 = vld [vmem:[#allocation8 + $0x70] sm:$0xff]  ;;  %v316_v30 = vld [vmem:[#allocation10] sm:$0xff] }
  0x6b   :  { %752 = vmatprep.subr.bf16.mxu0 %v1035_v0  ;;  %772 = vmatpush3.bf16.msra.mxu1 %v771_v35  ;;  %v804_v14 = vpack.c.bf16 %v310_v13, %v309_v12  ;;  %v317_v31 = vld [vmem:[#allocation10 + $0x8] sm:$0xff]  ;;  %v318_v33 = vld [vmem:[#allocation10 + $0x10] sm:$0xff]  ;;  %v319_v34 = vld [vmem:[#allocation10 + $0x18] sm:$0xff] }
  0x6c   :  { %773 = vmatprep.subr.bf16.mxu1 %v1035_v0  ;;  %v813_v32 = vpack.c.bf16 %v317_v31, %v316_v30  ;;  %v816_v35 = vpack.c.bf16 %v319_v34, %v318_v33  ;;  %v320_v36 = vld [vmem:[#allocation10 + $0x20] sm:$0xff]  ;;  %v321_v37 = vld [vmem:[#allocation10 + $0x28] sm:$0xff]  ;;  %v322_v39 = vld [vmem:[#allocation10 + $0x30] sm:$0xff] }
  0x6d   :  { %v323_v40 = vld [vmem:[#allocation10 + $0x38] sm:$0xff]  ;;  %v324_v42 = vld [vmem:[#allocation10 + $0x40] sm:$0xff]  ;;  %v325_v43 = vld [vmem:[#allocation10 + $0x48] sm:$0xff] }
  0x6e   :  { %754 = vmatpush3.bf16.msra.mxu0 %v753_v16  ;;  %v312_v16 = vld [vmem:[#allocation8 + $0x68] sm:$0xff]  ;;  %v326_v45 = vld [vmem:[#allocation10 + $0x50] sm:$0xff]  ;;  %v327_v46 = vld [vmem:[#allocation10 + $0x58] sm:$0xff] }
  0x6f   :  { %755 = vmatprep.subr.bf16.mxu0 %v1035_v0  ;;  %775 = vmatpush3.bf16.msra.mxu1 %v774_v38  ;;  %v807_v17 = vpack.c.bf16 %v312_v16, %v311_v15  ;;  %v819_v38 = vpack.c.bf16 %v321_v37, %v320_v36  ;;  %v328_v48 = vld [vmem:[#allocation10 + $0x60] sm:$0xff]  ;;  %v329_v49 = vld [vmem:[#allocation10 + $0x68] sm:$0xff] }
  0x70   :  { %776 = vmatprep.subr.bf16.mxu1 %v1035_v0 }
  0x72   :  { %757 = vmatpush3.bf16.msra.mxu0 %v756_v19  ;;  %v314_v19 = vld [vmem:[#allocation8 + $0x78] sm:$0xff] }
  0x73   :  { %758 = vmatprep.subr.bf16.mxu0 %v1035_v0  ;;  %778 = vmatpush3.bf16.msra.mxu1 %v777_v41  ;;  %v810_v20 = vpack.c.bf16 %v314_v19, %v313_v18  ;;  %v822_v41 = vpack.c.bf16 %v323_v40, %v322_v39 }
  0x74   :  { %779 = vmatprep.subr.bf16.mxu1 %v1035_v0 }
  0x76   :  { %760 = vmatpush3.bf16.msra.mxu0 %v759_v22 }
  0x77   :  { %761 = vmatprep.subr.bf16.mxu0 %v1035_v0  ;;  %781 = vmatpush3.bf16.msra.mxu1 %v780_v44  ;;  %v825_v44 = vpack.c.bf16 %v325_v43, %v324_v42 }
  0x78   :  { %782 = vmatprep.subr.bf16.mxu1 %v1035_v0 }
  0x7a   :  { %763 = vmatpush3.bf16.msra.mxu0 %v762_v25 }
  0x7b   :  { %788 = vmatprep.subr.bf16.mxu0 %v1035_v0  ;;  %784 = vmatpush3.bf16.msra.mxu1 %v783_v47  ;;  %v828_v47 = vpack.c.bf16 %v327_v46, %v326_v45 }
  0x7c   :  { %785 = vmatprep.subr.bf16.mxu1 %v1035_v0 }
  0x7d   :  { %633 = vmatmul.mubr.f32.vlgmr.msra.gmra.mrb[0].mxu0 %v102_v26 }
  0x7e   :  { %702 = vmatprep.mubr.msk.f32.mxu0 %vm1036_vm0, %v1037_v1  ;;  %790 = vmatpush3.bf16.msra.mxu0 %v789_v62 }
  0x7f   :  { %787 = vmatpush3.bf16.msra.mxu1 %v786_v50  ;;  %791 = vmatprep.subr.bf16.mxu0 %v1035_v0  ;;  %v831_v50 = vpack.c.bf16 %v329_v49, %v328_v48 }
  0x80   :  { %812 = vmatprep.subr.bf16.mxu1 %v1035_v0 }
  0x82   :  { %793 = vmatpush3.bf16.msra.mxu0 %v792_v3 }
  0x83   :  { %794 = vmatprep.subr.bf16.mxu0 %v1035_v0 }
  0x86   :  { %796 = vmatpush3.bf16.msra.mxu0 %v795_v6 }
  0x87   :  { %797 = vmatprep.subr.bf16.mxu0 %v1035_v0 }
 0x150   :  { %v192_v52 = vpop.f32.mrb[0].mxu0 }
 0x151   :  { %v193_v53 = vadd.f32 %v528_v51, %v192_v52  ;;  %v634_v54 = vpop.f32.mrb[1].mxu0  ;;  %v330_v51 = vld [vmem:[#allocation10 + $0x70] sm:$0xff]  ;;  %v331_v52 = vld [vmem:[#allocation10 + $0x78] sm:$0xff] }
 0x152   :  { %v530_v54 = vld [vmem:[%s1249_s6] ss:$0 sm:$0xff] }
 0x153   :  { %v196_v55 = vsub.f32 0.0, %v193_v53  ;;  %v834_v53 = vpack.c.bf16 %v331_v52, %v330_v51 }
 0x155   :  { %v197_v56 = vmul.f32 1.442695, %v196_v55 }
 0x157   :  { %848 = vpow2.f32 %v197_v56 }
 0x161   :  { %v849_v57 = vpop.eup %848 }
 0x162   :  { %v199_v58 = vadd.f32 1.0, %v849_v57 }
 0x164   :  { %850 = vrcp.f32 %v199_v58 }
 0x16e   :  { %v851_v59 = vpop.eup %850 }
 0x16f   :  { %668 = vmatmul.mubr.f32.vlgmr.msra.gmra.mrb[0].mxu1 %v851_v59 }
 0x170   :  { %737 = vmatprep.mubr.msk.f32.mxu1 %vm1036_vm0, %v1037_v1  ;;  %v306_v1 = vld [vmem:[#allocation8 + $0x38] sm:$0xff]  ;;  %814 = vmatpush3.bf16.msra.mxu1 %v813_v32 }
 0x171   :  { %v798_v8 = vpack.c.bf16 %v306_v1, %v305_v7  ;;  %815 = vmatprep.subr.bf16.mxu1 %v1035_v0 }
 0x173   :  { %799 = vmatpush3.bf16.msra.mxu0 %v798_v8 }
 0x174   :  { %800 = vmatprep.subr.bf16.mxu0 %v1035_v0  ;;  %817 = vmatpush3.bf16.msra.mxu1 %v816_v35 }
 0x175   :  { %818 = vmatprep.subr.bf16.mxu1 %v1035_v0 }
 0x177   :  { %802 = vmatpush3.bf16.msra.mxu0 %v801_v11 }
 0x178   :  { %803 = vmatprep.subr.bf16.mxu0 %v1035_v0  ;;  %820 = vmatpush3.bf16.msra.mxu1 %v819_v38 }
 0x179   :  { %821 = vmatprep.subr.bf16.mxu1 %v1035_v0 }
 0x17b   :  { %805 = vmatpush3.bf16.msra.mxu0 %v804_v14 }
 0x17c   :  { %806 = vmatprep.subr.bf16.mxu0 %v1035_v0  ;;  %823 = vmatpush3.bf16.msra.mxu1 %v822_v41 }
 0x17d   :  { %824 = vmatprep.subr.bf16.mxu1 %v1035_v0 }
 0x17f   :  { %808 = vmatpush3.bf16.msra.mxu0 %v807_v17 }
 0x180   :  { %809 = vmatprep.subr.bf16.mxu0 %v1035_v0  ;;  %826 = vmatpush3.bf16.msra.mxu1 %v825_v44 }
 0x181   :  { %827 = vmatprep.subr.bf16.mxu1 %v1035_v0 }
 0x183   :  { %811 = vmatpush3.bf16.msra.mxu0 %v810_v20 }
 0x184   :  { %829 = vmatpush3.bf16.msra.mxu1 %v828_v47 }
 0x185   :  { %830 = vmatprep.subr.bf16.mxu1 %v1035_v0 }
 0x188   :  { %832 = vmatpush3.bf16.msra.mxu1 %v831_v50 }
 0x189   :  { %833 = vmatprep.subr.bf16.mxu1 %v1035_v0 }
 0x18c   :  { %835 = vmatpush3.bf16.msra.mxu1 %v834_v53 }
 0x242   :  { %v290_v22 = vpop.f32.mrb[0].mxu1 }
 0x243   :  { %v291_v23 = vadd.f32 %v529_v21, %v290_v22  ;;  %v669_v24 = vpop.f32.mrb[1].mxu1 }
 0x245   :  { %v294_v25 = vsub.f32 0.0, %v291_v23 }
 0x247   :  { %v295_v26 = vmul.f32 1.442695, %v294_v25 }
 0x249   :  { %852 = vpow2.f32 %v295_v26 }
 0x253   :  { %v853_v27 = vpop.eup %852 }
 0x254   :  { %v297_v28 = vadd.f32 1.0, %v853_v27 }
 0x256   :  { %854 = vrcp.f32 %v297_v28 }
 0x260   :  { %v855_v29 = vpop.eup %854 }
 0x261   :  { %703 = vmatmul.mubr.f32.vlgmr.msra.gmra.mrb[2].mxu0 %v855_v29 }
 0x334   :  { %v405_v55 = vpop.f32.mrb[2].mxu0 }
 0x335   :  { %v406_v56 = vadd.f32 %v530_v54, %v405_v55  ;;  %v704_v57 = vpop.f32.mrb[3].mxu0 }
 0x337   :  { %v409_v58 = vsub.f32 0.0, %v406_v56 }
 0x339   :  { %v410_v59 = vmul.f32 1.442695, %v409_v58 }
 0x33b   :  { %856 = vpow2.f32 %v410_v59 }
 0x345   :  { %v857_v60 = vpop.eup %856 }
 0x346   :  { %v412_v61 = vadd.f32 1.0, %v857_v60 }
 0x348   :  { %858 = vrcp.f32 %v412_v61 }
 0x352   :  { %v859_v62 = vpop.eup %858 }
 0x353   :  { %495 = vst [vmem:[#allocation11] sm:$0xff] %v859_v62  ;;  %738 = vmatmul.mubr.f32.vlgmr.msra.gmra.mrb[2].mxu1 %v859_v62 }
 0x354   :  { %985 = shalt.err (!%p982_p2)
}
 0x355   :  { %s986_s14 = scalar_lea.hbm %s1252_s9, 128 }
 0x356   :  { %p987_p3 = scmp.ne.s32.totalorder %s1252_s9, %s986_s14  ;;  %p990_p4 = scmp.lt.u32.totalorder %s986_s14, %s1252_s9 }
 0x358   :  { %p992_p5 = pnand %p990_p4, %p987_p3 }
 0x35a   :  { %995 = shalt.err (!%p992_p5)
}
 0x35b   :  { %506 = dma.vmem_to_hbm [thread:$0]  %s504_s17, 128, %s1252_s9, [#allocation4]   ;;  %v531_v0 = vld [vmem:[%s1251_s8] ss:$0 sm:$0xff] }
 0x35c   :  { %s1039_s27 = smov [#allocation12]  }
 0x35d   :  { %s513_s29 = sshll.u32 %s1039_s27, 4  ;;  %s514_s29 = int_to_ptr.vmem [resolvable:$true] %s513_s29 }
 0x35e   :  { %s996_s11 = scalar_lea.vmem %s514_s29, 128  ;;  %p1001_p7 = scmp.lt.s32.totalorder %s514_s29, %s514_s29 }
 0x35f   :  { %p997_p6 = scmp.ne.s32.totalorder %s514_s29, %s996_s11  ;;  %p1002_p8 = scmp.lt.s32.totalorder %s996_s11, %s996_s11 }
 0x361   :  { %p1003_p9 = por %p1002_p8, %p1001_p7 }
 0x363   :  { %p1004_p10 = pnand %p1003_p9, %p997_p6 }
 0x426   :  { %v486_v63 = vpop.f32.mrb[2].mxu1 }
 0x427   :  { %v487_v2 = vadd.f32 %v531_v0, %v486_v63  ;;  %v739_v3 = vpop.f32.mrb[3].mxu1 }
 0x429   :  { %v490_v4 = vsub.f32 0.0, %v487_v2 }
 0x42b   :  { %v491_v5 = vmul.f32 1.442695, %v490_v4 }
 0x42d   :  { %860 = vpow2.f32 %v491_v5 }
 0x437   :  { %v861_v6 = vpop.eup %860 }
 0x438   :  { %v493_v7 = vadd.f32 1.0, %v861_v6 }
 0x43a   :  { %862 = vrcp.f32 %v493_v7 }
 0x444   :  { %v863_v1 = vpop.eup %862 }
 0x445   :  { %496 = vst [vmem:[#allocation12] sm:$0xff] %v863_v1 }
 0x446   :  { %1007 = shalt.err (!%p1004_p10)
}
 0x447   :  { %s1008_s5 = scalar_lea.hbm %s1253_s10, 128 }
 0x448   :  { %p1009_p11 = scmp.ne.s32.totalorder %s1253_s10, %s1008_s5  ;;  %p1012_p12 = scmp.lt.u32.totalorder %s1008_s5, %s1253_s10 }
 0x44a   :  { %p1014_p13 = pnand %p1012_p12, %p1009_p11 }
 0x44c   :  { %1017 = shalt.err (!%p1014_p13)
}
 0x44d   :  { %516 = dma.vmem_to_hbm [thread:$0]  %s514_s29, 128, %s1253_s10, [#allocation13]  }
 0x44e   :  { %1024 = dma.done.wait [#allocation4], 128  }
 0x44f   :  { %1025 = vsyncadd [#allocation4], 4294967168 }
 0x450   :  { %1026 = dma.done.wait [#allocation13], 128  }
 0x451   :  { %1027 = vsyncadd [#allocation13], 4294967168 }
 0x452   :  { %523 = vsyncpa [#allocation3], 1 }
 0x453   :  { %524 = vsyncpa [#allocation6], 1 }
 0x454   :  { %525 = vsyncpa [#allocation9], 1 }
 0x455   :  { %526 = vsyncpa [#allocation4], 1 }
 0x456   :  { %527 = vsyncpa [#allocation13], 1 }

</bundles_post_ra>
